<compile_context>
chip_gen: v5e
topology: v5e:2x2
jax: 0.10.0
libtpu: 0.0.40
codegen_flags: <defaults>
</compile_context>

<pallas_src>
import functools

import jax
import jax.numpy as jnp
from jax.experimental import pallas as pl
from jax.experimental.pallas import tpu as pltpu

NEG_SLOPE = 0.01
LN_EPS = 1e-5


def _tagging_kernel(adj_n_ref, adj_tn_ref, item_emb_ref, tag_emb_ref,
                    w_item_ref, w_tag_ref, aux_ref, w_final_ref,
                    out_ref, *, num_layers):
    # Pre-normalized adjacencies (mean aggregation baked in by the wrapper).
    adj_n = adj_n_ref[...]      # (Ni, Nt): row i scaled by 1/deg_item[i]
    adj_tn = adj_tn_ref[...]    # (Nt, Ni): row t scaled by 1/deg_tag[t]
    h_item = item_emb_ref[...]  # (Ni, H)
    h_tag = tag_emb_ref[...]    # (Nt, H)

    for l in range(num_layers):            # static unroll (L is small)
        aux_l = aux_ref[l]                  # (4, H) lane-dense param slab
        b_item = aux_l[0:1]                 # (1, H)
        b_tag = aux_l[1:2]
        ln_g = aux_l[2:3]
        ln_b = aux_l[3:4]

        # relation 'ras' (tag -> item), SAGEConv(mean), self+neighbor fused:
        #   [h_item | mean_nbr_tag] @ [[W_self^T],[W_neigh^T]] -> one MXU dot
        neigh_item = jnp.dot(adj_n, h_tag, preferred_element_type=jnp.float32)
        x_item = jnp.concatenate([h_item, neigh_item], axis=-1)       # (Ni, 2H)
        new_item = jnp.dot(x_item, w_item_ref[l],
                           preferred_element_type=jnp.float32) + b_item

        # relation 'as' (item -> tag) — the last layer's tag update is never
        # consumed by the item output path, so it is skipped (and its weights
        # are not even passed in by the wrapper).
        if l + 1 < num_layers:
            neigh_tag = jnp.dot(adj_tn, h_item,
                                preferred_element_type=jnp.float32)
            x_tag = jnp.concatenate([h_tag, neigh_tag], axis=-1)      # (Nt, 2H)
            h_tag = jnp.dot(x_tag, w_tag_ref[l],
                            preferred_element_type=jnp.float32) + b_tag

        # LayerNorm on item features only (biased variance, like torch).
        mu = jnp.mean(new_item, axis=-1, keepdims=True)
        diff = new_item - mu
        var = jnp.mean(diff * diff, axis=-1, keepdims=True)
        h_item = diff * jax.lax.rsqrt(var + LN_EPS) * ln_g + ln_b
        # feat_drop(p=0.2) is identity in eval mode.
        # TODO(synk): training-mode dropout (stateful PRNG mask) not implemented.

    # final = LeakyReLU(Linear(h_item, bias=False), 0.01); weight pre-transposed.
    final = jnp.dot(h_item, w_final_ref[...], preferred_element_type=jnp.float32)
    out_ref[...] = jnp.where(final >= 0.0, final, NEG_SLOPE * final)


def tagging_items_pallas(adj, item_emb, tag_emb, params, num_layers):
    ni, hidden = item_emb.shape
    nt = tag_emb.shape[0]

    # ---- wrapper-side layout plumbing (hoisted out of the kernel) -----------
    adj = adj.astype(jnp.float32)
    # mean-aggregator degrees, clamped so isolated nodes get a zero message
    deg_item = jnp.maximum(jnp.sum(adj, axis=1, keepdims=True), 1.0)   # (Ni, 1)
    deg_tag = jnp.maximum(jnp.sum(adj, axis=0, keepdims=True), 1.0)    # (1, Nt)
    adj_norm = adj / deg_item                                          # (Ni, Nt)
    adj_t_norm = adj.T / deg_tag.T                                     # (Nt, Ni)

    # pre-transpose (PyTorch (out,in) -> (in,out)) and fuse self|neighbor
    # weights along the contraction axis: (L, 2H, H)
    w_item_fused = jnp.concatenate(
        [jnp.transpose(params["w_self_item"], (0, 2, 1)),
         jnp.transpose(params["w_neigh_item"], (0, 2, 1))], axis=1)
    w_tag_fused = jnp.concatenate(
        [jnp.transpose(params["w_self_tag"], (0, 2, 1)),
         jnp.transpose(params["w_neigh_tag"], (0, 2, 1))], axis=1)
    # the last layer's tag-side weights are dead code for the item output:
    # don't DMA them at all (keep at least one layer so the ref is non-empty).
    w_tag_fused = w_tag_fused[:max(num_layers - 1, 1)]
    # pack bias / LayerNorm params lane-dense: (L, 4, H)
    aux = jnp.concatenate(
        [params["b_item"], params["b_tag"], params["ln_g"], params["ln_b"]],
        axis=1)
    w_final_t = params["w_final"].T                                    # (H, H)

    # Advisory cost estimate so XLA schedules sensibly around the custom call.
    flops = 0
    for l in range(num_layers):
        flops += 2 * ni * nt * hidden + 2 * ni * (2 * hidden) * hidden
        if l + 1 < num_layers:
            flops += 2 * nt * ni * hidden + 2 * nt * (2 * hidden) * hidden
        flops += 8 * ni * hidden                    # LayerNorm-ish VPU work
    flops += 2 * ni * hidden * hidden               # final linear
    inputs = (adj_norm, adj_t_norm, item_emb, tag_emb,
              w_item_fused, w_tag_fused, aux, w_final_t)
    bytes_accessed = sum(int(x.size) * 4 for x in inputs) + ni * hidden * 4
    cost = pl.CostEstimate(flops=int(flops),
                           transcendentals=int(num_layers * ni),
                           bytes_accessed=int(bytes_accessed))

    # TODO(synk): for production Ni (>> VMEM, esp. v7x 64 MiB), add a grid over
    # item-row tiles with "parallel" on the item axis and an accumulated output
    # for the item->tag reduction; at these subgraph sizes a single resident
    # block is fastest (no per-step pipeline overhead).
    vmem = pl.BlockSpec(memory_space=pltpu.MemorySpace.VMEM)
    return pl.pallas_call(
        functools.partial(_tagging_kernel, num_layers=num_layers),
        out_shape=jax.ShapeDtypeStruct((ni, hidden), jnp.float32),
        in_specs=[vmem] * 8,
        out_specs=vmem,
        cost_estimate=cost,
    )(adj_norm, adj_t_norm, item_emb, tag_emb,
      w_item_fused, w_tag_fused, aux, w_final_t)


if __name__ == "__main__":
    key = jax.random.PRNGKey(0)
    item_num, tag_num, hidden, num_layers = 16, 10, 128, 2   # hidden = module default

    keys = jax.random.split(key, 8)
    gain = (2.0 / (1.0 + NEG_SLOPE ** 2)) ** 0.5  # calculate_gain('leaky_relu', 0.01)

    def xavier_normal(k, shape):
        fan_out, fan_in = shape[-2], shape[-1]
        std = gain * (2.0 / (fan_in + fan_out)) ** 0.5
        return (std * jax.random.normal(k, shape)).astype(jnp.float32)

    # Embedding tables (xavier_normal per reset_parameters)
    item_table = xavier_normal(keys[0], (item_num, hidden))
    tag_table = xavier_normal(keys[1], (tag_num, hidden))

    # Per-layer SAGEConv weights (PyTorch Linear convention: (out, in), y = x @ W.T)
    params = dict(
        w_self_item=xavier_normal(keys[2], (num_layers, hidden, hidden)),
        w_neigh_item=xavier_normal(keys[3], (num_layers, hidden, hidden)),
        b_item=jnp.zeros((num_layers, 1, hidden), jnp.float32),
        w_self_tag=xavier_normal(keys[4], (num_layers, hidden, hidden)),
        w_neigh_tag=xavier_normal(keys[5], (num_layers, hidden, hidden)),
        b_tag=jnp.zeros((num_layers, 1, hidden), jnp.float32),
        ln_g=jnp.ones((num_layers, 1, hidden), jnp.float32),
        ln_b=jnp.zeros((num_layers, 1, hidden), jnp.float32),
        w_final=xavier_normal(keys[6], (hidden, hidden)),
    )

    # Batch of item ids (with repeats, like the torch.unique path)
    items = jnp.array([3, 7, 3, 1, 9, 7, 5, 1], dtype=jnp.int32)
    unique_items, inverse_indices = jnp.unique(items, return_inverse=True)
    num_unique = int(unique_items.shape[0])

    # Deterministic dense item-tag adjacency for the sampled subgraph
    adj = (jax.random.uniform(keys[7], (num_unique, tag_num)) < 0.4).astype(jnp.float32)

    # Glue: embedding lookups (gather) stay in plain JAX
    item_emb = item_table[unique_items]   # (Ni, H)
    tag_emb = tag_table                   # (Nt, H) — all tag nodes of the subgraph

    out_unique = tagging_items_pallas(adj, item_emb, tag_emb, params, num_layers)
    reconstructed_item_embed = out_unique[inverse_indices]   # glue: back to batch order
    jax.block_until_ready(reconstructed_item_embed)

    assert reconstructed_item_embed.shape == (items.shape[0], hidden)
    assert reconstructed_item_embed.dtype == jnp.float32
    print("KERNEL_OK")
</pallas_src>

<mosaic_0001>
module attributes {stable_mosaic.version = 11 : i64} {
  func.func @_tagging_kernel(%arg0: memref<5x10xf32, #tpu.memory_space<vmem>>, %arg1: memref<10x5xf32, #tpu.memory_space<vmem>>, %arg2: memref<5x128xf32, #tpu.memory_space<vmem>>, %arg3: memref<10x128xf32, #tpu.memory_space<vmem>>, %arg4: memref<2x256x128xf32, #tpu.memory_space<vmem>>, %arg5: memref<1x256x128xf32, #tpu.memory_space<vmem>>, %arg6: memref<2x4x128xf32, #tpu.memory_space<vmem>>, %arg7: memref<128x128xf32, #tpu.memory_space<vmem>>, %arg8: memref<5x128xf32, #tpu.memory_space<vmem>>) attributes {dimension_semantics = [], scalar_prefetch = 0 : i64, scratch_operands = 0 : i64, tpu.core_type = #tpu.core_type<tc>} {
    %c0 = arith.constant 0 : index
    %c0_0 = arith.constant 0 : index
    %0 = vector.load %arg0[%c0, %c0_0] : memref<5x10xf32, #tpu.memory_space<vmem>>, vector<5x10xf32>
    %c0_1 = arith.constant 0 : index
    %c0_2 = arith.constant 0 : index
    %1 = vector.load %arg1[%c0_1, %c0_2] : memref<10x5xf32, #tpu.memory_space<vmem>>, vector<10x5xf32>
    %c0_3 = arith.constant 0 : index
    %c0_4 = arith.constant 0 : index
    %2 = vector.load %arg2[%c0_3, %c0_4] : memref<5x128xf32, #tpu.memory_space<vmem>>, vector<5x128xf32>
    %c0_5 = arith.constant 0 : index
    %c0_6 = arith.constant 0 : index
    %3 = vector.load %arg3[%c0_5, %c0_6] : memref<10x128xf32, #tpu.memory_space<vmem>>, vector<10x128xf32>
    %c0_7 = arith.constant 0 : index
    %c0_8 = arith.constant 0 : index
    %c0_9 = arith.constant 0 : index
    %4 = vector.load %arg6[%c0_7, %c0_8, %c0_9] : memref<2x4x128xf32, #tpu.memory_space<vmem>>, vector<1x4x128xf32>
    %5 = vector.shape_cast %4 : vector<1x4x128xf32> to vector<4x128xf32>
    %6 = vector.extract_strided_slice %5 {offsets = [0, 0], sizes = [1, 128], strides = [1, 1]} : vector<4x128xf32> to vector<1x128xf32>
    %7 = vector.extract_strided_slice %5 {offsets = [1, 0], sizes = [1, 128], strides = [1, 1]} : vector<4x128xf32> to vector<1x128xf32>
    %8 = vector.extract_strided_slice %5 {offsets = [2, 0], sizes = [1, 128], strides = [1, 1]} : vector<4x128xf32> to vector<1x128xf32>
    %9 = vector.extract_strided_slice %5 {offsets = [3, 0], sizes = [1, 128], strides = [1, 1]} : vector<4x128xf32> to vector<1x128xf32>
    %cst = arith.constant dense<0.000000e+00> : vector<5x128xf32>
    %10 = tpu.matmul %0, %3, %cst {dimension_numbers = #tpu.dot_dimension_numbers<[1], [0], [0], [1], [0, 0, 1, 1], [], []>} : vector<5x10xf32>, vector<10x128xf32>, vector<5x128xf32> -> vector<5x128xf32>
    %11 = tpu.concatenate %2, %10 in 1 : vector<5x128xf32>, vector<5x128xf32> -> vector<5x256xf32>
    %c0_10 = arith.constant 0 : index
    %c0_11 = arith.constant 0 : index
    %c0_12 = arith.constant 0 : index
    %12 = vector.load %arg4[%c0_10, %c0_11, %c0_12] : memref<2x256x128xf32, #tpu.memory_space<vmem>>, vector<1x256x128xf32>
    %13 = vector.shape_cast %12 : vector<1x256x128xf32> to vector<256x128xf32>
    %cst_13 = arith.constant dense<0.000000e+00> : vector<5x128xf32>
    %14 = tpu.matmul %11, %13, %cst_13 {dimension_numbers = #tpu.dot_dimension_numbers<[1], [0], [0], [1], [0, 0, 1, 1], [], []>} : vector<5x256xf32>, vector<256x128xf32>, vector<5x128xf32> -> vector<5x128xf32>
    %15 = vector.broadcast %6 : vector<1x128xf32> to vector<5x128xf32>
    %16 = arith.addf %14, %15 : vector<5x128xf32>
    %cst_14 = arith.constant dense<0.000000e+00> : vector<10x128xf32>
    %17 = tpu.matmul %1, %2, %cst_14 {dimension_numbers = #tpu.dot_dimension_numbers<[1], [0], [0], [1], [0, 0, 1, 1], [], []>} : vector<10x5xf32>, vector<5x128xf32>, vector<10x128xf32> -> vector<10x128xf32>
    %18 = tpu.concatenate %3, %17 in 1 : vector<10x128xf32>, vector<10x128xf32> -> vector<10x256xf32>
    %c0_15 = arith.constant 0 : index
    %c0_16 = arith.constant 0 : index
    %c0_17 = arith.constant 0 : index
    %19 = vector.load %arg5[%c0_15, %c0_16, %c0_17] : memref<1x256x128xf32, #tpu.memory_space<vmem>>, vector<1x256x128xf32>
    %20 = vector.shape_cast %19 : vector<1x256x128xf32> to vector<256x128xf32>
    %cst_18 = arith.constant dense<0.000000e+00> : vector<10x128xf32>
    %21 = tpu.matmul %18, %20, %cst_18 {dimension_numbers = #tpu.dot_dimension_numbers<[1], [0], [0], [1], [0, 0, 1, 1], [], []>} : vector<10x256xf32>, vector<256x128xf32>, vector<10x128xf32> -> vector<10x128xf32>
    %22 = vector.broadcast %7 : vector<1x128xf32> to vector<10x128xf32>
    %23 = arith.addf %21, %22 : vector<10x128xf32>
    %cst_19 = arith.constant dense<0.000000e+00> : vector<5xf32>
    %24 = vector.multi_reduction <add>, %16, %cst_19 [1] : vector<5x128xf32> to vector<5xf32>
    %25 = vector.shape_cast %24 : vector<5xf32> to vector<5x1xf32>
    %cst_20 = arith.constant 1.280000e+02 : f32
    %26 = vector.broadcast %cst_20 : f32 to vector<5x1xf32>
    %27 = arith.divf %25, %26 : vector<5x1xf32>
    %28 = vector.broadcast %27 : vector<5x1xf32> to vector<5x128xf32>
    %29 = arith.subf %16, %28 : vector<5x128xf32>
    %30 = arith.mulf %29, %29 : vector<5x128xf32>
    %cst_21 = arith.constant dense<0.000000e+00> : vector<5xf32>
    %31 = vector.multi_reduction <add>, %30, %cst_21 [1] : vector<5x128xf32> to vector<5xf32>
    %32 = vector.shape_cast %31 : vector<5xf32> to vector<5x1xf32>
    %cst_22 = arith.constant 1.280000e+02 : f32
    %33 = vector.broadcast %cst_22 : f32 to vector<5x1xf32>
    %34 = arith.divf %32, %33 : vector<5x1xf32>
    %cst_23 = arith.constant 9.99999974E-6 : f32
    %35 = vector.broadcast %cst_23 : f32 to vector<5x1xf32>
    %36 = arith.addf %34, %35 : vector<5x1xf32>
    %37 = math.rsqrt %36 : vector<5x1xf32>
    %38 = vector.broadcast %37 : vector<5x1xf32> to vector<5x128xf32>
    %39 = arith.mulf %29, %38 : vector<5x128xf32>
    %40 = vector.broadcast %8 : vector<1x128xf32> to vector<5x128xf32>
    %41 = arith.mulf %39, %40 : vector<5x128xf32>
    %42 = vector.broadcast %9 : vector<1x128xf32> to vector<5x128xf32>
    %43 = arith.addf %41, %42 : vector<5x128xf32>
    %c1 = arith.constant 1 : index
    %c0_24 = arith.constant 0 : index
    %c0_25 = arith.constant 0 : index
    %44 = vector.load %arg6[%c1, %c0_24, %c0_25] : memref<2x4x128xf32, #tpu.memory_space<vmem>>, vector<1x4x128xf32>
    %45 = vector.shape_cast %44 : vector<1x4x128xf32> to vector<4x128xf32>
    %46 = vector.extract_strided_slice %45 {offsets = [0, 0], sizes = [1, 128], strides = [1, 1]} : vector<4x128xf32> to vector<1x128xf32>
    %47 = vector.extract_strided_slice %45 {offsets = [2, 0], sizes = [1, 128], strides = [1, 1]} : vector<4x128xf32> to vector<1x128xf32>
    %48 = vector.extract_strided_slice %45 {offsets = [3, 0], sizes = [1, 128], strides = [1, 1]} : vector<4x128xf32> to vector<1x128xf32>
    %cst_26 = arith.constant dense<0.000000e+00> : vector<5x128xf32>
    %49 = tpu.matmul %0, %23, %cst_26 {dimension_numbers = #tpu.dot_dimension_numbers<[1], [0], [0], [1], [0, 0, 1, 1], [], []>} : vector<5x10xf32>, vector<10x128xf32>, vector<5x128xf32> -> vector<5x128xf32>
    %50 = tpu.concatenate %43, %49 in 1 : vector<5x128xf32>, vector<5x128xf32> -> vector<5x256xf32>
    %c1_27 = arith.constant 1 : index
    %c0_28 = arith.constant 0 : index
    %c0_29 = arith.constant 0 : index
    %51 = vector.load %arg4[%c1_27, %c0_28, %c0_29] : memref<2x256x128xf32, #tpu.memory_space<vmem>>, vector<1x256x128xf32>
    %52 = vector.shape_cast %51 : vector<1x256x128xf32> to vector<256x128xf32>
    %cst_30 = arith.constant dense<0.000000e+00> : vector<5x128xf32>
    %53 = tpu.matmul %50, %52, %cst_30 {dimension_numbers = #tpu.dot_dimension_numbers<[1], [0], [0], [1], [0, 0, 1, 1], [], []>} : vector<5x256xf32>, vector<256x128xf32>, vector<5x128xf32> -> vector<5x128xf32>
    %54 = vector.broadcast %46 : vector<1x128xf32> to vector<5x128xf32>
    %55 = arith.addf %53, %54 : vector<5x128xf32>
    %cst_31 = arith.constant dense<0.000000e+00> : vector<5xf32>
    %56 = vector.multi_reduction <add>, %55, %cst_31 [1] : vector<5x128xf32> to vector<5xf32>
    %57 = vector.shape_cast %56 : vector<5xf32> to vector<5x1xf32>
    %cst_32 = arith.constant 1.280000e+02 : f32
    %58 = vector.broadcast %cst_32 : f32 to vector<5x1xf32>
    %59 = arith.divf %57, %58 : vector<5x1xf32>
    %60 = vector.broadcast %59 : vector<5x1xf32> to vector<5x128xf32>
    %61 = arith.subf %55, %60 : vector<5x128xf32>
    %62 = arith.mulf %61, %61 : vector<5x128xf32>
    %cst_33 = arith.constant dense<0.000000e+00> : vector<5xf32>
    %63 = vector.multi_reduction <add>, %62, %cst_33 [1] : vector<5x128xf32> to vector<5xf32>
    %64 = vector.shape_cast %63 : vector<5xf32> to vector<5x1xf32>
    %cst_34 = arith.constant 1.280000e+02 : f32
    %65 = vector.broadcast %cst_34 : f32 to vector<5x1xf32>
    %66 = arith.divf %64, %65 : vector<5x1xf32>
    %cst_35 = arith.constant 9.99999974E-6 : f32
    %67 = vector.broadcast %cst_35 : f32 to vector<5x1xf32>
    %68 = arith.addf %66, %67 : vector<5x1xf32>
    %69 = math.rsqrt %68 : vector<5x1xf32>
    %70 = vector.broadcast %69 : vector<5x1xf32> to vector<5x128xf32>
    %71 = arith.mulf %61, %70 : vector<5x128xf32>
    %72 = vector.broadcast %47 : vector<1x128xf32> to vector<5x128xf32>
    %73 = arith.mulf %71, %72 : vector<5x128xf32>
    %74 = vector.broadcast %48 : vector<1x128xf32> to vector<5x128xf32>
    %75 = arith.addf %73, %74 : vector<5x128xf32>
    %c0_36 = arith.constant 0 : index
    %c0_37 = arith.constant 0 : index
    %76 = vector.load %arg7[%c0_36, %c0_37] : memref<128x128xf32, #tpu.memory_space<vmem>>, vector<128x128xf32>
    %cst_38 = arith.constant dense<0.000000e+00> : vector<5x128xf32>
    %77 = tpu.matmul %75, %76, %cst_38 {dimension_numbers = #tpu.dot_dimension_numbers<[1], [0], [0], [1], [0, 0, 1, 1], [], []>} : vector<5x128xf32>, vector<128x128xf32>, vector<5x128xf32> -> vector<5x128xf32>
    %cst_39 = arith.constant 0.000000e+00 : f32
    %78 = vector.broadcast %cst_39 : f32 to vector<5x128xf32>
    %79 = arith.cmpf oge, %77, %78 : vector<5x128xf32>
    %cst_40 = arith.constant 0.00999999977 : f32
    %80 = vector.broadcast %cst_40 : f32 to vector<5x128xf32>
    %81 = arith.mulf %80, %77 : vector<5x128xf32>
    %82 = arith.select %79, %77, %81 : vector<5x128xi1>, vector<5x128xf32>
    %c0_41 = arith.constant 0 : index
    %c0_42 = arith.constant 0 : index
    %83 = vector.load %arg8[%c0_41, %c0_42] : memref<5x128xf32, #tpu.memory_space<vmem>>, vector<5x128xf32>
    tpu.vector_store %arg8[%c0_41, %c0_42], %82 {strides = array<i32>} : memref<5x128xf32, #tpu.memory_space<vmem>>, vector<5x128xf32>,
    return
  }
}

</mosaic_0001>

<bundles_post_ra>
// kernel: tpu_custom_call.1
= control target key start
LH: loop header
LB: loop body
LE: loop exit
PB: predicated region body
PF: predicated region fallthrough
CT: control target
= control target key end

     0   :  { %13 = vsyncpa [#allocation3], 0  ;;  %s861_s0 = inlined_call_operand.vmem [shape: f32[5,10], index: 0, kind: input, shape index: {}]   ;;  %s862_s1 = inlined_call_operand.vmem [shape: f32[10,5], index: 1, kind: input, shape index: {}]   ;;  %s863_s2 = inlined_call_operand.hbm [shape: f32[5,128], index: 2, kind: input, shape index: {}]   ;;  %s864_s3 = inlined_call_operand.vmem [shape: f32[10,128], index: 3, kind: input, shape index: {}]   ;;  %s865_s4 = inlined_call_operand.hbm [shape: f32[2,256,128], index: 4, kind: input, shape index: {}]   ;;  %s866_s5 = inlined_call_operand.hbm [shape: f32[1,256,128], index: 5, kind: input, shape index: {}]   ;;  %s867_s6 = inlined_call_operand.hbm [shape: f32[2,4,128], index: 6, kind: input, shape index: {}]   ;;  %s868_s7 = inlined_call_operand.hbm [shape: f32[128,128], index: 7, kind: input, shape index: {}]   ;;  %s869_s8 = inlined_call_operand.hbm [shape: f32[5,128], index: 8, kind: output, shape index: {}]  }
   0x1   :  { %14 = vsyncpa [#allocation6], 0 }
   0x2   :  { %15 = vsyncpa [#allocation9], 0  ;;  %s38_s29 = sshll.u32 %s865_s4, 4  ;;  %s39_s29 = int_to_ptr.hbm [resolvable:$true] %s38_s29 }
   0x3   :  { %16 = vsyncpa [#allocation4], 0  ;;  %s720_s30 = smov [#allocation5]   ;;  %s64_s12 = sshll.u32 %s867_s6, 4  ;;  %s65_s12 = int_to_ptr.hbm [resolvable:$true] %s64_s12 }
   0x4   :  { %s40_s9 = sshll.u32 %s720_s30, 4  ;;  %s721_s13 = smov 128   ;;  %s41_s9 = int_to_ptr.vmem [resolvable:$true] %s40_s9 }
   0x5   :  { %s722_s14 = smov 8   ;;  %s723_s15 = smov [#allocation8]  }
   0x6   :  { %46 = dma.hbm_to_vmem [thread:$0]  %s39_s29, 8192, %s41_s9, [#allocation6], %s721_s13, %s721_s13, %s722_s14  }
   0x7   :  { %s66_s16 = sshll.u32 %s723_s15, 4  ;;  %s724_s4 = smov 64   ;;  %s67_s16 = int_to_ptr.vmem [resolvable:$true] %s66_s16 }
   0x8   :  { %s725_s17 = smov 4   ;;  %s26_s20 = sshll.u32 %s863_s2, 4  ;;  %s27_s20 = int_to_ptr.hbm [resolvable:$true] %s26_s20 }
   0x9   :  { %72 = dma.hbm_to_vmem [thread:$0]  %s65_s12, 128, %s67_s16, [#allocation9], %s724_s4, %s724_s4, %s725_s17  }
   0xa   :  { %s726_s21 = smov [#allocation2]   ;;  %s51_s24 = sshll.u32 %s866_s5, 4  ;;  %s52_s24 = int_to_ptr.hbm [resolvable:$true] %s51_s24 }
   0xb   :  { %s28_s6 = sshll.u32 %s726_s21, 4  ;;  %s727_s25 = smov [#allocation7]   ;;  %s29_s6 = int_to_ptr.vmem [resolvable:$true] %s28_s6 }
   0xc   :  { %31 = dma.hbm_to_vmem [thread:$0]  %s27_s20, 128, %s29_s6, [#allocation3]  }
   0xd   :  { %s53_s26 = sshll.u32 %s727_s25, 4  ;;  %s77_s29 = sshll.u32 %s868_s7, 4  ;;  %s54_s26 = int_to_ptr.vmem [resolvable:$true] %s53_s26  ;;  %s78_s29 = int_to_ptr.hbm [resolvable:$true] %s77_s29 }
   0xe   :  { %59 = dma.hbm_to_vmem [thread:$0]  %s52_s24, 4096, %s54_s26, [#allocation6], %s721_s13, %s721_s13, %s722_s14  }
   0xf   :  { %s728_s2 = smov [#allocation10]  }
  0x10   :  { %s79_s30 = sshll.u32 %s728_s2, 4  ;;  %s80_s30 = int_to_ptr.vmem [resolvable:$true] %s79_s30 }
  0x11   :  { %85 = dma.hbm_to_vmem [thread:$0]  %s78_s29, 2048, %s80_s30, [#allocation9], %s721_s13, %s721_s13, %s722_s14  }
  0x12   :  { %712 = dma.done.wait [#allocation3], 128  }
  0x13   :  { %713 = vsyncadd [#allocation3], 4294967168 }
  0x14   :  { %714 = dma.done.wait [#allocation6], 12288  }
  0x15   :  { %715 = vsyncadd [#allocation6], 4294955008 }
  0x16   :  { %716 = dma.done.wait [#allocation9], 2176  }
  0x17   :  { %717 = vsyncadd [#allocation9], 4294965120  ;;  %vm117_vm0 = vcmask 1041408   ;;  %v803_v0 = vld [vmem:[%s864_s3 + $0x8] sm:$0x3]  ;;  %v808_v1 = vld [vmem:[%s864_s3] sm:$0xff] }
  0x18   :  { %544 = vmatpush.msk.msra.mxu1 %vm117_vm0, %v803_v0  ;;  %v815_v2 = vld [vmem:[%s861_s0] sm:$0x1f]  ;;  %vm113_vm1 = vcmask 80896   ;;  %v155_v4 = vld [vmem:[#allocation5 + $0x70] sm:$0xff]  ;;  %v154_v7 = vld [vmem:[#allocation5 + $0x68] sm:$0xff]  ;;  %vm221_vm2 = vcmask 1044480  }
  0x19   :  { %v156_v3 = vld [vmem:[#allocation5 + $0x78] sm:$0xff]  ;;  %v171_v6 = vld [vmem:[#allocation5 + $0xf0] sm:$0xff]  ;;  %v170_v8 = vld [vmem:[#allocation5 + $0xe8] sm:$0xff]  ;;  %vm214_vm3 = vcmask 39936   ;;  %s532_s17 = sshll.u32 %s869_s8, 4  ;;  %s533_s17 = int_to_ptr.hbm [resolvable:$true] %s532_s17 }
  0x1a   :  { %136 = vmatpush.msra.mxu1 %v808_v1  ;;  %v172_v5 = vld [vmem:[#allocation5 + $0xf8] sm:$0xff]  ;;  %v153_v9 = vld [vmem:[#allocation5 + $0x60] sm:$0xff]  ;;  %v151_v13 = vld [vmem:[#allocation5 + $0x50] sm:$0xff] }
  0x1b   :  { %545 = vmatmul.msk.f32.vlgmr.msra.gmra.mxu1 %vm113_vm1, %v815_v2  ;;  %194 = vmatpush.msra.mxu2 %v172_v5  ;;  %v169_v10 = vld [vmem:[#allocation5 + $0xe0] sm:$0xff]  ;;  %v152_v11 = vld [vmem:[#allocation5 + $0x58] sm:$0xff]  ;;  %v167_v14 = vld [vmem:[#allocation5 + $0xd0] sm:$0xff] }
  0x1c   :  { %174 = vmatpush.msrb.mxu1 %v156_v3  ;;  %v168_v12 = vld [vmem:[#allocation5 + $0xd8] sm:$0xff]  ;;  %v150_v15 = vld [vmem:[#allocation5 + $0x48] sm:$0xff]  ;;  %v149_v17 = vld [vmem:[#allocation5 + $0x40] sm:$0xff] }
  0x1d   :  { %195 = vmatpush.msra.mxu2 %v171_v6  ;;  %v166_v16 = vld [vmem:[#allocation5 + $0xc8] sm:$0xff]  ;;  %v165_v18 = vld [vmem:[#allocation5 + $0xc0] sm:$0xff]  ;;  %v148_v19 = vld [vmem:[#allocation5 + $0x38] sm:$0xff] }
  0x1e   :  { %175 = vmatpush.msrb.mxu1 %v155_v4  ;;  %v164_v20 = vld [vmem:[#allocation5 + $0xb8] sm:$0xff]  ;;  %v147_v21 = vld [vmem:[#allocation5 + $0x30] sm:$0xff]  ;;  %v146_v23 = vld [vmem:[#allocation5 + $0x28] sm:$0xff] }
  0x1f   :  { %196 = vmatpush.msra.mxu2 %v170_v8  ;;  %v163_v22 = vld [vmem:[#allocation5 + $0xb0] sm:$0xff]  ;;  %v162_v24 = vld [vmem:[#allocation5 + $0xa8] sm:$0xff]  ;;  %v145_v25 = vld [vmem:[#allocation5 + $0x20] sm:$0xff] }
  0x20   :  { %176 = vmatpush.msrb.mxu1 %v154_v7  ;;  %v161_v26 = vld [vmem:[#allocation5 + $0xa0] sm:$0xff]  ;;  %v144_v27 = vld [vmem:[#allocation5 + $0x18] sm:$0xff]  ;;  %v143_v29 = vld [vmem:[#allocation5 + $0x10] sm:$0xff] }
  0x21   :  { %197 = vmatpush.msra.mxu2 %v169_v10  ;;  %v160_v28 = vld [vmem:[#allocation5 + $0x98] sm:$0xff]  ;;  %v159_v30 = vld [vmem:[#allocation5 + $0x90] sm:$0xff]  ;;  %v142_v31 = vld [vmem:[#allocation5 + $0x8] sm:$0xff] }
  0x22   :  { %177 = vmatpush.msrb.mxu1 %v153_v9  ;;  %v158_v32 = vld [vmem:[#allocation5 + $0x88] sm:$0xff]  ;;  %v141_v33 = vld [vmem:[#allocation5] sm:$0xff]  ;;  %v109_v34 = vld [vmem:[#allocation2] sm:$0x1f] }
  0x23   :  { %198 = vmatpush.msra.mxu2 %v168_v12  ;;  %v107_v35 = vld [vmem:[%s862_s1] sm:$0xff]  ;;  %v108_v36 = vld [vmem:[%s862_s1 + $0x8] sm:$0x3]  ;;  %v262_v39 = vld [vmem:[#allocation7 + $0x70] sm:$0xff]  ;;  %s730_s1 = smov [#allocation11]  }
  0x24   :  { %178 = vmatpush.msrb.mxu1 %v152_v11  ;;  %v157_v37 = vld [vmem:[#allocation5 + $0x80] sm:$0xff]  ;;  %v263_v38 = vld [vmem:[#allocation7 + $0x78] sm:$0xff]  ;;  %v261_v41 = vld [vmem:[#allocation7 + $0x68] sm:$0xff]  ;;  %s530_s15 = sshll.u32 %s730_s1, 4  ;;  %s531_s15 = int_to_ptr.vmem [resolvable:$true] %s530_s15 }
  0x25   :  { %199 = vmatpush.msra.mxu2 %v167_v14  ;;  %281 = vmatpush.msra.mxu3 %v263_v38  ;;  %v279_v40 = vld [vmem:[#allocation7 + $0xf8] sm:$0xff]  ;;  %v278_v42 = vld [vmem:[#allocation7 + $0xf0] sm:$0xff]  ;;  %v277_v43 = vld [vmem:[#allocation7 + $0xe8] sm:$0xff] }
  0x26   :  { %179 = vmatpush.msrb.mxu1 %v151_v13  ;;  %304 = vmatpush.msra.mxu0 %v279_v40  ;;  %v260_v44 = vld [vmem:[#allocation7 + $0x60] sm:$0xff]  ;;  %v259_v46 = vld [vmem:[#allocation7 + $0x58] sm:$0xff]  ;;  %v258_v48 = vld [vmem:[#allocation7 + $0x50] sm:$0xff] }
  0x27   :  { %200 = vmatpush.msra.mxu2 %v166_v16  ;;  %282 = vmatpush.msra.mxu3 %v262_v39  ;;  %v276_v45 = vld [vmem:[#allocation7 + $0xe0] sm:$0xff]  ;;  %v275_v47 = vld [vmem:[#allocation7 + $0xd8] sm:$0xff]  ;;  %v274_v49 = vld [vmem:[#allocation7 + $0xd0] sm:$0xff] }
  0x28   :  { %180 = vmatpush.msrb.mxu1 %v150_v15  ;;  %305 = vmatpush.msra.mxu0 %v278_v42  ;;  %v257_v50 = vld [vmem:[#allocation7 + $0x48] sm:$0xff]  ;;  %v256_v52 = vld [vmem:[#allocation7 + $0x40] sm:$0xff]  ;;  %v255_v54 = vld [vmem:[#allocation7 + $0x38] sm:$0xff] }
  0x29   :  { %201 = vmatpush.msra.mxu2 %v165_v18  ;;  %283 = vmatpush.msra.mxu3 %v261_v41  ;;  %v273_v51 = vld [vmem:[#allocation7 + $0xc8] sm:$0xff]  ;;  %v272_v53 = vld [vmem:[#allocation7 + $0xc0] sm:$0xff]  ;;  %v271_v55 = vld [vmem:[#allocation7 + $0xb8] sm:$0xff] }
  0x2a   :  { %181 = vmatpush.msrb.mxu1 %v149_v17  ;;  %306 = vmatpush.msra.mxu0 %v277_v43  ;;  %v254_v56 = vld [vmem:[#allocation7 + $0x30] sm:$0xff]  ;;  %v253_v58 = vld [vmem:[#allocation7 + $0x28] sm:$0xff]  ;;  %v252_v60 = vld [vmem:[#allocation7 + $0x20] sm:$0xff] }
  0x2b   :  { %202 = vmatpush.msra.mxu2 %v164_v20  ;;  %284 = vmatpush.msra.mxu3 %v260_v44  ;;  %v270_v57 = vld [vmem:[#allocation7 + $0xb0] sm:$0xff]  ;;  %v269_v59 = vld [vmem:[#allocation7 + $0xa8] sm:$0xff]  ;;  %v251_v61 = vld [vmem:[#allocation7 + $0x18] sm:$0xff] }
  0x2c   :  { %182 = vmatpush.msrb.mxu1 %v148_v19  ;;  %307 = vmatpush.msra.mxu0 %v276_v45  ;;  %v250_v62 = vld [vmem:[#allocation7 + $0x10] sm:$0xff]  ;;  %v249_v63 = vld [vmem:[#allocation7 + $0x8] sm:$0xff]  ;;  %v248_v4 = vld [vmem:[#allocation7] sm:$0xff] }
  0x2d   :  { %203 = vmatpush.msra.mxu2 %v163_v22  ;;  %285 = vmatpush.msra.mxu3 %v259_v46  ;;  %v268_v5 = vld [vmem:[#allocation7 + $0xa0] sm:$0xff]  ;;  %v267_v6 = vld [vmem:[#allocation7 + $0x98] sm:$0xff]  ;;  %v266_v7 = vld [vmem:[#allocation7 + $0x90] sm:$0xff] }
  0x2e   :  { %183 = vmatpush.msrb.mxu1 %v147_v21  ;;  %308 = vmatpush.msra.mxu0 %v275_v47  ;;  %v265_v8 = vld [vmem:[#allocation7 + $0x88] sm:$0xff]  ;;  %v264_v9 = vld [vmem:[#allocation7 + $0x80] sm:$0xff]  ;;  %v416_v41 = vld [vmem:[#allocation5 + $0x1f0] sm:$0xff] }
  0x2f   :  { %204 = vmatpush.msra.mxu2 %v162_v24  ;;  %286 = vmatpush.msra.mxu3 %v258_v48  ;;  %v829_v13 = vld [vmem:[#allocation8] sm:$0xf]  ;;  %v399_v40 = vld [vmem:[#allocation5 + $0x168] sm:$0xff]  ;;  %v397_v44 = vld [vmem:[#allocation5 + $0x158] sm:$0xff] }
  0x30   :  { %184 = vmatpush.msrb.mxu1 %v146_v23  ;;  %309 = vmatpush.msra.mxu0 %v274_v49  ;;  %v173_v14 = vperm.slane %v829_v13, 0  ;;  %v280_v20 = vperm.slane %v829_v13, 1  ;;  %v398_v42 = vld [vmem:[#allocation5 + $0x160] sm:$0xff]  ;;  %v415_v43 = vld [vmem:[#allocation5 + $0x1e8] sm:$0xff]  ;;  %v396_v46 = vld [vmem:[#allocation5 + $0x150] sm:$0xff] }
  0x31   :  { %205 = vmatpush.msra.mxu2 %v161_v26  ;;  %287 = vmatpush.msra.mxu3 %v257_v50  ;;  %v729_v26 = vmov 128.0   ;;  %v414_v45 = vld [vmem:[#allocation5 + $0x1e0] sm:$0xff]  ;;  %v413_v47 = vld [vmem:[#allocation5 + $0x1d8] sm:$0xff]  ;;  %v395_v48 = vld [vmem:[#allocation5 + $0x148] sm:$0xff] }
  0x32   :  { %185 = vmatpush.msrb.mxu1 %v145_v25  ;;  %310 = vmatpush.msra.mxu0 %v273_v51  ;;  %562 = vrcp.f32 %v729_v26  ;;  %v412_v49 = vld [vmem:[#allocation5 + $0x1d0] sm:$0xff]  ;;  %v394_v50 = vld [vmem:[#allocation5 + $0x140] sm:$0xff]  ;;  %v411_v51 = vld [vmem:[#allocation5 + $0x1c8] sm:$0xff] }
  0x33   :  { %206 = vmatpush.msra.mxu2 %v160_v28  ;;  %288 = vmatpush.msra.mxu3 %v256_v52  ;;  %v400_v28 = vld [vmem:[#allocation5 + $0x170] sm:$0xff]  ;;  %v393_v52 = vld [vmem:[#allocation5 + $0x138] sm:$0xff] }
  0x34   :  { %186 = vmatpush.msrb.mxu1 %v144_v27  ;;  %311 = vmatpush.msra.mxu0 %v272_v53  ;;  %v401_v27 = vld [vmem:[#allocation5 + $0x178] sm:$0xff]  ;;  %v410_v53 = vld [vmem:[#allocation5 + $0x1c0] sm:$0xff] }
  0x35   :  { %207 = vmatpush.msra.mxu2 %v159_v30  ;;  %289 = vmatpush.msra.mxu3 %v255_v54  ;;  %v392_v54 = vld [vmem:[#allocation5 + $0x130] sm:$0xff] }
  0x36   :  { %187 = vmatpush.msrb.mxu1 %v143_v29  ;;  %312 = vmatpush.msra.mxu0 %v271_v55  ;;  %v417_v29 = vld [vmem:[#allocation5 + $0x1f8] sm:$0xff] }
  0x37   :  { %208 = vmatpush.msra.mxu2 %v158_v32  ;;  %290 = vmatpush.msra.mxu3 %v254_v56  ;;  %v409_v55 = vld [vmem:[#allocation5 + $0x1b8] sm:$0xff]  ;;  %v391_v56 = vld [vmem:[#allocation5 + $0x128] sm:$0xff] }
  0x38   :  { %188 = vmatpush.msrb.mxu1 %v142_v31  ;;  %313 = vmatpush.msra.mxu0 %v270_v57  ;;  %v563_v30 = vpop.eup %562  ;;  %v408_v57 = vld [vmem:[#allocation5 + $0x1b0] sm:$0xff] }
  0x39   :  { %209 = vmatpush.msra.mxu2 %v157_v37  ;;  %291 = vmatpush.msra.mxu3 %v253_v58  ;;  %v331_v31 = vmul.f32 128.0, %v563_v30  ;;  %vm335_vm4 = vweird.f32 %v563_v30  ;;  %v390_v58 = vld [vmem:[#allocation5 + $0x120] sm:$0xff] }
  0x3a   :  { %189 = vmatpush.msrb.mxu1 %v141_v33  ;;  %314 = vmatpush.msra.mxu0 %v269_v59  ;;  %v407_v59 = vld [vmem:[#allocation5 + $0x1a8] sm:$0xff] }
  0x3b   :  { %190 = vmatmul.f32.vlgmr.msrb.gmra.mxu1 %v109_v34  ;;  %292 = vmatpush.msra.mxu3 %v252_v60  ;;  %v332_v32 = vsub.f32 1.0, %v331_v31  ;;  %v389_v60 = vld [vmem:[#allocation5 + $0x118] sm:$0xff] }
  0x3c   :  { %546 = vmatpush.msk.msra.mxu1 %vm221_vm2, %v109_v34  ;;  %315 = vmatpush.msra.mxu0 %v268_v5  ;;  %v386_v5 = vld [vmem:[#allocation5 + $0x100] sm:$0xff]  ;;  %v499_v31 = vld [vmem:[#allocation10 + $0x70] sm:$0xff] }
  0x3d   :  { %293 = vmatpush.msra.mxu3 %v251_v61  ;;  %419 = vmatpush.msrb.mxu2 %v401_v27  ;;  %v333_v33 = vmul.f32 %v563_v30, %v332_v32  ;;  %v406_v61 = vld [vmem:[#allocation5 + $0x1a0] sm:$0xff] }
  0x3e   :  { %316 = vmatpush.msra.mxu0 %v267_v6  ;;  %v403_v6 = vld [vmem:[#allocation5 + $0x188] sm:$0xff] }
  0x3f   :  { %294 = vmatpush.msra.mxu3 %v250_v62  ;;  %420 = vmatpush.msrb.mxu2 %v400_v28  ;;  %v334_v34 = vadd.f32 %v563_v30, %v333_v33  ;;  %v388_v62 = vld [vmem:[#allocation5 + $0x110] sm:$0xff] }
  0x40   :  { %317 = vmatpush.msra.mxu0 %v266_v7 }
  0x41   :  { %295 = vmatpush.msra.mxu3 %v249_v63  ;;  %421 = vmatpush.msrb.mxu2 %v399_v40  ;;  %v405_v63 = vld [vmem:[#allocation5 + $0x198] sm:$0xff]  ;;  %v494_v40 = vld [vmem:[#allocation10 + $0x48] sm:$0xff] }
  0x42   :  { %318 = vmatpush.msra.mxu0 %v265_v8  ;;  %v402_v8 = vld [vmem:[#allocation5 + $0x180] sm:$0xff] }
  0x43   :  { %547 = vmatmul.msk.f32.vlgmr.msra.gmra.mxu1 %vm214_vm3, %v107_v35  ;;  %296 = vmatpush.msra.mxu3 %v248_v4  ;;  %v837_v35 = vsel %vm335_vm4, %v563_v30, %v334_v34  ;;  %v404_v4 = vld [vmem:[#allocation5 + $0x190] sm:$0xff]  ;;  %v500_v30 = vld [vmem:[#allocation10 + $0x78] sm:$0xff] }
  0x44   :  { %297 = vmatmul.f32.vlgmr.msra.gmra.mxu3 %v808_v1  ;;  %319 = vmatpush.msra.mxu0 %v264_v9 }
  0x45   :  { %439 = vmatpush.msrb.mxu3 %v417_v29  ;;  %422 = vmatpush.msrb.mxu2 %v398_v42  ;;  %v492_v42 = vld [vmem:[#allocation10 + $0x38] sm:$0xff] }
  0x46   :  { %501 = vmatpush.msrb.mxu0 %v500_v30 }
  0x47   :  { %440 = vmatpush.msrb.mxu3 %v416_v41  ;;  %423 = vmatpush.msrb.mxu2 %v397_v44  ;;  %v493_v41 = vld [vmem:[#allocation10 + $0x40] sm:$0xff]  ;;  %v490_v44 = vld [vmem:[#allocation10 + $0x28] sm:$0xff] }
  0x48   :  { %502 = vmatpush.msrb.mxu0 %v499_v31 }
  0x49   :  { %441 = vmatpush.msrb.mxu3 %v415_v43  ;;  %424 = vmatpush.msrb.mxu2 %v396_v46  ;;  %v491_v43 = vld [vmem:[#allocation10 + $0x30] sm:$0xff]  ;;  %v488_v46 = vld [vmem:[#allocation10 + $0x18] sm:$0xff] }
  0x4b   :  { %548 = vmatmul.msk.f32.gmra.mxu1 %vm214_vm3, %v108_v36  ;;  %442 = vmatpush.msrb.mxu3 %v414_v45  ;;  %v489_v45 = vld [vmem:[#allocation10 + $0x20] sm:$0xff] }
  0x4c   :  { %300 = vmatmul.f32.gmra.mxu3 %v803_v0  ;;  %425 = vmatpush.msrb.mxu2 %v395_v48  ;;  %v486_v48 = vld [vmem:[#allocation10 + $0x8] sm:$0xff] }
  0x4d   :  { %443 = vmatpush.msrb.mxu3 %v413_v47  ;;  %v487_v47 = vld [vmem:[#allocation10 + $0x10] sm:$0xff] }
  0x4e   :  { %426 = vmatpush.msrb.mxu2 %v394_v50 }
  0x4f   :  { %444 = vmatpush.msrb.mxu3 %v412_v49  ;;  %v485_v49 = vld [vmem:[#allocation10] sm:$0xff] }
  0x50   :  { %427 = vmatpush.msrb.mxu2 %v393_v52 }
  0x51   :  { %445 = vmatpush.msrb.mxu3 %v411_v51 }
  0x52   :  { %428 = vmatpush.msrb.mxu2 %v392_v54 }
  0x53   :  { %446 = vmatpush.msrb.mxu3 %v410_v53 }
  0x54   :  { %429 = vmatpush.msrb.mxu2 %v391_v56 }
  0x55   :  { %447 = vmatpush.msrb.mxu3 %v409_v55 }
  0x56   :  { %430 = vmatpush.msrb.mxu2 %v390_v58 }
  0x57   :  { %448 = vmatpush.msrb.mxu3 %v408_v57 }
  0x58   :  { %431 = vmatpush.msrb.mxu2 %v389_v60 }
  0x59   :  { %449 = vmatpush.msrb.mxu3 %v407_v59 }
  0x5a   :  { %432 = vmatpush.msrb.mxu2 %v388_v62 }
  0x5b   :  { %450 = vmatpush.msrb.mxu3 %v406_v61 }
  0x5d   :  { %451 = vmatpush.msrb.mxu3 %v405_v63 }
  0x5f   :  { %452 = vmatpush.msrb.mxu3 %v404_v4 }
  0x61   :  { %453 = vmatpush.msrb.mxu3 %v403_v6 }
  0x63   :  { %454 = vmatpush.msrb.mxu3 %v402_v8 }
  0x98   :  { %v138_v3 = vpop.f32.mrf.mxu1 }
  0x99   :  { %210 = vmatmul.f32.vlgmr.msra.gmra.mxu2 %v138_v3  ;;  %v387_v3 = vld [vmem:[#allocation5 + $0x108] sm:$0xff] }
  0x9a   :  { %433 = vmatpush.msrb.mxu2 %v387_v3 }
  0x9c   :  { %434 = vmatpush.msrb.mxu2 %v386_v5 }
  0xb8   :  { %v191_v10 = vpop.f32.mrf.mxu1 }
  0xb9   :  { %v192_v15 = vadd.f32 %v191_v10, %v173_v14 }
  0xc0   :  { %v242_v11 = vpop.f32.mrf.mxu1 }
  0xc1   :  { %320 = vmatmul.f32.vlgmr.msra.gmra.mxu0 %v242_v11 }
  0xc7   :  { %v298_v18 = vpop.f32.mrf.mxu3 }
  0xc8   :  { %v245_v12 = vpop.f32.mrf.mxu1  ;;  %v299_v21 = vadd.f32 %v298_v18, %v280_v20  ;;  %v356_v18 = vperm.slane %v829_v13, 2 }
  0xc9   :  { %323 = vmatmul.f32.gmra.mxu0 %v245_v12 }
  0xcf   :  { %v301_v0 = vpop.f32.mrf.mxu3 }
  0xd0   :  { %v302_v22 = vadd.f32 %v301_v0, %v280_v20  ;;  %v358_v0 = vperm.slane %v829_v13, 3 }
 0x11c   :  { %v211_v1 = vpop.f32.mrf.mxu2 }
 0x11d   :  { %v212_v16 = vadd.f32 %v211_v1, %v192_v15 }
 0x11f   :  { %v327_v17 = vsel %vm221_vm2, %v212_v16, 0.0 }
 0x120   :  { %328 = vadd.xlane.f32.xlu0 %v327_v17 }
 0x13e   :  { %v321_v19 = vpop.f32.mrf.mxu0 }
 0x13f   :  { %v322_v24 = vadd.f32 %v321_v19, %v299_v21 }
 0x146   :  { %v324_v23 = vpop.f32.mrf.mxu0 }
 0x147   :  { %v325_v25 = vadd.f32 %v324_v23, %v302_v22  ;;  %v849_v23 = vld [vmem:[#allocation8 + $0x4] sm:$0xf] }
 0x148   :  { %v481_v59 = vperm.slane %v849_v23, 2  ;;  %v483_v62 = vperm.slane %v849_v23, 3 }
 0x149   :  { %549 = vmatpush.msk.msrb.mxu1 %vm117_vm0, %v325_v25 }
 0x14b   :  { %380 = vmatpush.msrb.mxu1 %v322_v24  ;;  %v418_v24 = vperm.slane %v849_v23, 0 }
 0x14c   :  { %550 = vmatmul.msk.f32.vlgmr.msrb.gmra.mxu1 %vm113_vm1, %v815_v2 }
 0x193   :  { %v329_v36 = vpop.xlane.xlu0 %328 }
 0x194   :  { %v337_v37 = vmul.f32 %v837_v35, %v329_v36 }
 0x196   :  { %v840_v2 = vsub.f32 %v212_v16, %v337_v37  ;;  %v498_v37 = vld [vmem:[#allocation10 + $0x68] sm:$0xff] }
 0x197   :  { %503 = vmatpush.msrb.mxu0 %v498_v37 }
 0x198   :  { %v339_v38 = vmul.f32 %v840_v2, %v840_v2 }
 0x19a   :  { %v340_v39 = vsel %vm221_vm2, %v339_v38, 0.0  ;;  %v496_v38 = vld [vmem:[#allocation10 + $0x58] sm:$0xff] }
 0x19b   :  { %341 = vadd.xlane.f32.xlu0 %v340_v39  ;;  %v495_v39 = vld [vmem:[#allocation10 + $0x50] sm:$0xff] }
 0x1c9   :  { %v382_v7 = vpop.f32.mrf.mxu1 }
 0x1ca   :  { %455 = vmatmul.f32.vlgmr.msrb.gmra.mxu3 %v382_v7 }
 0x20e   :  { %v342_v9 = vpop.xlane.xlu0 %341 }
 0x20f   :  { %v343_v10 = vmul.f32 %v342_v9, %v837_v35 }
 0x211   :  { %v344_v11 = vadd.f32 1e-05, %v343_v10 }
 0x213   :  { %564 = vrsqrt.f32 %v344_v11  ;;  %vm351_vm6 = vweird.f32 %v344_v11 }
 0x219   :  { %v565_v12 = vpop.eup %564 }
 0x21a   :  { %v346_v14 = vmul.f32 %v565_v12, %v344_v11  ;;  %vm352_vm5 = vweird.f32 %v565_v12 }
 0x21b   :  { %vm353_vm7 = vmor %vm351_vm6, %vm352_vm5 }
 0x21c   :  { %v347_v15 = vmul.f32 %v565_v12, %v346_v14 }
 0x21e   :  { %v348_v1 = vmul.f32 0.5, %v347_v15 }
 0x220   :  { %v349_v16 = vsub.f32 1.5, %v348_v1 }
 0x222   :  { %v350_v17 = vmul.f32 %v565_v12, %v349_v16 }
 0x224   :  { %v354_v19 = vsel %vm353_vm7, %v565_v12, %v350_v17 }
 0x225   :  { %v355_v20 = vmul.f32 %v354_v19, %v840_v2  ;;  %v497_v2 = vld [vmem:[#allocation10 + $0x60] sm:$0xff] }
 0x226   :  { %504 = vmatpush.msrb.mxu0 %v497_v2 }
 0x227   :  { %v357_v21 = vmul.f32 %v356_v18, %v355_v20 }
 0x228   :  { %505 = vmatpush.msrb.mxu0 %v496_v38 }
 0x229   :  { %v359_v22 = vadd.f32 %v358_v0, %v357_v21 }
 0x22a   :  { %506 = vmatpush.msrb.mxu0 %v495_v39 }
 0x22b   :  { %435 = vmatmul.f32.vlgmr.msrb.gmra.mxu2 %v359_v22 }
 0x22c   :  { %507 = vmatpush.msrb.mxu0 %v494_v40 }
 0x22e   :  { %508 = vmatpush.msrb.mxu0 %v493_v41 }
 0x230   :  { %509 = vmatpush.msrb.mxu0 %v492_v42 }
 0x232   :  { %510 = vmatpush.msrb.mxu0 %v491_v43 }
 0x234   :  { %511 = vmatpush.msrb.mxu0 %v490_v44 }
 0x236   :  { %512 = vmatpush.msrb.mxu0 %v489_v45 }
 0x238   :  { %513 = vmatpush.msrb.mxu0 %v488_v46 }
 0x23a   :  { %514 = vmatpush.msrb.mxu0 %v487_v47 }
 0x23c   :  { %515 = vmatpush.msrb.mxu0 %v486_v48 }
 0x23e   :  { %516 = vmatpush.msrb.mxu0 %v485_v49 }
 0x24d   :  { %v456_v26 = vpop.f32.mrf.mxu3 }
 0x2ae   :  { %v436_v25 = vpop.f32.mrf.mxu2 }
 0x2af   :  { %v437_v27 = vadd.f32 %v436_v25, %v418_v24 }
 0x2b1   :  { %v457_v28 = vadd.f32 %v456_v26, %v437_v27 }
 0x2b3   :  { %v459_v29 = vsel %vm221_vm2, %v457_v28, 0.0 }
 0x2b4   :  { %460 = vadd.xlane.f32.xlu1 %v459_v29 }
 0x327   :  { %v461_v32 = vpop.xlane.xlu1 %460 }
 0x328   :  { %v462_v13 = vmul.f32 %v461_v32, %v837_v35 }
 0x32a   :  { %v463_v33 = vsub.f32 %v457_v28, %v462_v13 }
 0x32c   :  { %v464_v34 = vmul.f32 %v463_v33, %v463_v33 }
 0x32e   :  { %v465_v36 = vsel %vm221_vm2, %v464_v34, 0.0 }
 0x32f   :  { %466 = vadd.xlane.f32.xlu1 %v465_v36 }
 0x3a2   :  { %v467_v50 = vpop.xlane.xlu1 %466 }
 0x3a3   :  { %v468_v51 = vmul.f32 %v467_v50, %v837_v35 }
 0x3a5   :  { %v469_v52 = vadd.f32 1e-05, %v468_v51 }
 0x3a7   :  { %566 = vrsqrt.f32 %v469_v52  ;;  %vm476_vm9 = vweird.f32 %v469_v52 }
 0x3ad   :  { %v567_v53 = vpop.eup %566 }
 0x3ae   :  { %v471_v54 = vmul.f32 %v567_v53, %v469_v52  ;;  %vm477_vm8 = vweird.f32 %v567_v53 }
 0x3af   :  { %vm478_vm10 = vmor %vm476_vm9, %vm477_vm8 }
 0x3b0   :  { %v472_v55 = vmul.f32 %v567_v53, %v471_v54 }
 0x3b2   :  { %v473_v56 = vmul.f32 0.5, %v472_v55 }
 0x3b4   :  { %v474_v57 = vsub.f32 1.5, %v473_v56 }
 0x3b6   :  { %v475_v58 = vmul.f32 %v567_v53, %v474_v57 }
 0x3b8   :  { %v479_v60 = vsel %vm478_vm10, %v567_v53, %v475_v58 }
 0x3b9   :  { %v480_v61 = vmul.f32 %v479_v60, %v463_v33 }
 0x3bb   :  { %v482_v63 = vmul.f32 %v481_v59, %v480_v61 }
 0x3bd   :  { %v484_v3 = vadd.f32 %v483_v62, %v482_v63 }
 0x3bf   :  { %517 = vmatmul.f32.vlgmr.msrb.gmra.mxu0 %v484_v3 }
 0x43c   :  { %v518_v35 = vpop.f32.mrf.mxu0 }
 0x43d   :  { %vm521_vm11 = vcmp.ge.f32.partialorder %v518_v35, 0.0  ;;  %v522_v4 = vmul.f32 0.01, %v518_v35 }
 0x43f   :  { %v523_v5 = vsel %vm521_vm11, %v518_v35, %v522_v4 }
 0x440   :  { %524 = vst [vmem:[#allocation11] sm:$0x1f] %v523_v5 }
 0x441   :  { %535 = dma.vmem_to_hbm [thread:$0]  %s531_s15, 128, %s533_s17, [#allocation4]  }
 0x442   :  { %718 = dma.done.wait [#allocation4], 128  }
 0x443   :  { %719 = vsyncadd [#allocation4], 4294967168 }
 0x444   :  { %540 = vsyncpa [#allocation3], 1 }
 0x445   :  { %541 = vsyncpa [#allocation6], 1 }
 0x446   :  { %542 = vsyncpa [#allocation9], 1 }
 0x447   :  { %543 = vsyncpa [#allocation4], 1 }

</bundles_post_ra>
